<compile_context>
chip_gen: v7x
topology: tpu7x:2x2x1
jax: 0.10.0
libtpu: 0.0.40
codegen_flags: <defaults>
</compile_context>

<pallas_src>
import functools

import jax
import jax.numpy as jnp
from jax import lax
from jax.experimental import pallas as pl
from jax.experimental.pallas import tpu as pltpu


# ----------------------------------------------------------------------------
# Fused conv3x3 + bias + ReLU (+ optional 2x2 max-pool) kernel.
#
# The padded image is flattened to (Hp*Wp, Cin) so every 3x3 tap is a contiguous
# sublane slice of the VMEM block; the conv is 9 shifted dots accumulated in f32
# (im2col stays in-register).  With pool=True each grid step computes two conv
# rows and writes one pooled output row; the width-pair max uses stride-2
# sublane loads from a small VMEM scratch row.
# The activation block stays f32 in VMEM (dynamic unaligned sublane slices of
# packed bf16 are avoided); slices are cast to bf16 right before the MXU dot.
# ----------------------------------------------------------------------------
def _conv_kernel(x_ref, w_ref, b_ref, o_ref, row_scr, *, Wp, pool):
    W = row_scr.shape[0]            # conv-row width (pre-pool)
    cout = o_ref.shape[-1]
    i = pl.program_id(1)

    def conv_row(h):
        acc = jnp.zeros((W, cout), jnp.float32)
        for k in range(9):
            dy, dx = k // 3, k % 3
            a = x_ref[0, pl.ds((h + dy) * Wp + dx, W), :].astype(jnp.bfloat16)
            acc = acc + jnp.dot(a, w_ref[k], preferred_element_type=jnp.float32)
        return acc

    bias = b_ref[...]
    if pool:
        rm = jnp.maximum(jnp.maximum(conv_row(2 * i), conv_row(2 * i + 1)) + bias, 0.0)
        row_scr[...] = rm
        pooled = jnp.maximum(row_scr[pl.ds(0, W // 2, 2), :],
                             row_scr[pl.ds(1, W // 2, 2), :])
        o_ref[0, 0] = pooled.astype(o_ref.dtype)
    else:
        o_ref[0, 0] = jnp.maximum(conv_row(i) + bias, 0.0).astype(o_ref.dtype)


def conv3x3(x, w, b, *, pool):
    """x: (B,H,W,Cin) NHWC; w: (Cout,Cin,3,3) PyTorch layout; SAME padding."""
    B, H, W, Cin = x.shape
    Cout = w.shape[0]
    if pool:
        assert H % 2 == 0 and W % 2 == 0  # TODO(synk): ceil-mode pooling for odd sizes
    Hp, Wp = H + 2, W + 2
    xflat = jnp.pad(x.astype(jnp.float32),
                    ((0, 0), (1, 1), (1, 1), (0, 0))).reshape(B, Hp * Wp, Cin)
    wk = jnp.transpose(w, (2, 3, 1, 0)).reshape(9, Cin, Cout).astype(jnp.bfloat16)
    bias = b.reshape(1, Cout).astype(jnp.float32)
    rows = H // 2 if pool else H
    Wo = W // 2 if pool else W
    # TODO(synk): at realistic resolutions tile several output rows per grid
    # step and cap vmem via pltpu.CompilerParams(vmem_limit_bytes=...) on v7x.
    return pl.pallas_call(
        functools.partial(_conv_kernel, Wp=Wp, pool=pool),
        out_shape=jax.ShapeDtypeStruct((B, rows, Wo, Cout), jnp.bfloat16),
        grid=(B, rows),
        in_specs=[
            pl.BlockSpec((1, Hp * Wp, Cin), lambda bb, ii: (bb, 0, 0)),
            pl.BlockSpec((9, Cin, Cout), lambda bb, ii: (0, 0, 0)),
            pl.BlockSpec((1, Cout), lambda bb, ii: (0, 0)),
        ],
        out_specs=pl.BlockSpec((1, 1, Wo, Cout), lambda bb, ii: (bb, ii, 0, 0)),
        scratch_shapes=[pltpu.VMEM((W, Cout), jnp.float32)],
        compiler_params=pltpu.CompilerParams(
            dimension_semantics=("parallel", "parallel")),
    )(xflat, wk, bias)


# ----------------------------------------------------------------------------
# Row-tiled matmul + bias (+ReLU): bf16 operands, f32 accumulate.
# Used for the fused RPN 1x1 cls+bbox heads.
# ----------------------------------------------------------------------------
def _linear_kernel(a_ref, w_ref, b_ref, o_ref, *, relu):
    acc = jnp.dot(a_ref[...], w_ref[...], preferred_element_type=jnp.float32) + b_ref[...]
    if relu:
        acc = jnp.maximum(acc, 0.0)
    o_ref[...] = acc.astype(o_ref.dtype)


def pallas_linear(a, w, b, *, relu=False):
    M, K = a.shape
    N = w.shape[1]
    tm = min(128, ((M + 7) // 8) * 8)         # round rows to sublane tile, not 128
    Mp = ((M + tm - 1) // tm) * tm
    a_p = a if Mp == M else jnp.pad(a, ((0, Mp - M), (0, 0)))
    out = pl.pallas_call(
        functools.partial(_linear_kernel, relu=relu),
        out_shape=jax.ShapeDtypeStruct((Mp, N), jnp.float32),
        grid=(Mp // tm,),
        in_specs=[
            pl.BlockSpec((tm, K), lambda i: (i, 0)),
            pl.BlockSpec((K, N), lambda i: (0, 0)),
            pl.BlockSpec((1, N), lambda i: (0, 0)),
        ],
        out_specs=pl.BlockSpec((tm, N), lambda i: (i, 0)),
        compiler_params=pltpu.CompilerParams(dimension_semantics=("parallel",)),
    )(a_p.astype(jnp.bfloat16), w.astype(jnp.bfloat16),
      b.reshape(1, N).astype(jnp.float32))
    return out[:M] if Mp != M else out


# ----------------------------------------------------------------------------
# Fused Box_Head + Box_Outs: fc6 -> relu -> fc7 -> relu -> [cls|bbox] heads,
# with the cls softmax folded into the epilogue (pl.reciprocal approx).
# Output columns: [0:num_classes) = cls_prob, [num_classes:) = bbox_pred.
# ----------------------------------------------------------------------------
def _box_head_kernel(x_ref, w6_ref, b6_ref, w7_ref, b7_ref, wo_ref, bo_ref,
                     o_ref, *, num_classes):
    h6 = jnp.dot(x_ref[...], w6_ref[...], preferred_element_type=jnp.float32) + b6_ref[...]
    h6 = jnp.maximum(h6, 0.0)
    h7 = jnp.dot(h6.astype(jnp.bfloat16), w7_ref[...],
                 preferred_element_type=jnp.float32) + b7_ref[...]
    h7 = jnp.maximum(h7, 0.0)
    acc = jnp.dot(h7.astype(jnp.bfloat16), wo_ref[...],
                  preferred_element_type=jnp.float32) + bo_ref[...]
    col = lax.broadcasted_iota(jnp.int32, acc.shape, 1)
    is_cls = col < num_classes
    m = jnp.max(jnp.where(is_cls, acc, -jnp.inf), axis=1, keepdims=True)
    e = jnp.exp(jnp.where(is_cls, acc - m, 0.0))
    s = jnp.sum(jnp.where(is_cls, e, 0.0), axis=1, keepdims=True)
    sm = e * pl.reciprocal(s, approx=True)
    o_ref[...] = jnp.where(is_cls, sm, acc).astype(o_ref.dtype)


def pallas_box_head(pooled, w6, b6, w7, b7, wo, bo, *, num_classes):
    R, F = pooled.shape
    D = w6.shape[1]
    NO = wo.shape[1]
    bf, f32 = jnp.bfloat16, jnp.float32
    return pl.pallas_call(
        functools.partial(_box_head_kernel, num_classes=num_classes),
        out_shape=jax.ShapeDtypeStruct((R, NO), jnp.float32),
        grid=(1,),
        in_specs=[
            pl.BlockSpec((R, F), lambda i: (0, 0)),
            pl.BlockSpec((F, D), lambda i: (0, 0)),
            pl.BlockSpec((1, D), lambda i: (0, 0)),
            pl.BlockSpec((D, D), lambda i: (0, 0)),
            pl.BlockSpec((1, D), lambda i: (0, 0)),
            pl.BlockSpec((D, NO), lambda i: (0, 0)),
            pl.BlockSpec((1, NO), lambda i: (0, 0)),
        ],
        out_specs=pl.BlockSpec((R, NO), lambda i: (0, 0)),
        compiler_params=pltpu.CompilerParams(dimension_semantics=("arbitrary",)),
    )(pooled.astype(bf), w6.astype(bf), b6.reshape(1, D).astype(f32),
      w7.astype(bf), b7.reshape(1, D).astype(f32),
      wo.astype(bf), bo.reshape(1, NO).astype(f32))


# ----------------------------------------------------------------------------
# RoIPoolF: separable max reduction (res width-bin passes over W, then res
# height-bin passes), lane-dense (res*C)-wide output rows.
# ----------------------------------------------------------------------------
def _roipool_kernel(bidx_ref, box_ref, feat_ref, out_ref, *, res):
    r = pl.program_id(0)
    x1 = box_ref[r, 0]
    y1 = box_ref[r, 1]
    x2 = box_ref[r, 2]
    y2 = box_ref[r, 3]
    roi_w = jnp.maximum(x2 - x1 + 1, 1)
    roi_h = jnp.maximum(y2 - y1 + 1, 1)
    bin_w = roi_w.astype(jnp.float32) / float(res)
    bin_h = roi_h.astype(jnp.float32) / float(res)

    feat = feat_ref[0].astype(jnp.float32)            # (H, W, C)
    H, W, C = feat.shape
    widx = lax.broadcasted_iota(jnp.int32, (H, W), 1)

    # pass 1: per-row maxima of each width bin, concatenated lane-dense.
    cms = []
    for pw in range(res):
        wstart = jnp.clip(x1 + jnp.floor(pw * bin_w).astype(jnp.int32), 0, W)
        wend = jnp.clip(x1 + jnp.ceil((pw + 1) * bin_w).astype(jnp.int32), 0, W)
        wmask = (widx >= wstart) & (widx < wend)
        cms.append(jnp.max(jnp.where(wmask[:, :, None], feat, -jnp.inf), axis=1))
    cm = jnp.concatenate(cms, axis=1)                 # (H, res*C)

    # pass 2: reduce each height bin; one (res*C,) lane-dense store per bin row.
    hrow = lax.broadcasted_iota(jnp.int32, (H, res * C), 0)
    for ph in range(res):
        hstart = jnp.clip(y1 + jnp.floor(ph * bin_h).astype(jnp.int32), 0, H)
        hend = jnp.clip(y1 + jnp.ceil((ph + 1) * bin_h).astype(jnp.int32), 0, H)
        hmask = (hrow >= hstart) & (hrow < hend)
        row = jnp.max(jnp.where(hmask, cm, -jnp.inf), axis=0)
        row = jnp.where(row == -jnp.inf, 0.0, row)    # empty bins -> 0
        out_ref[0, ph, :] = row.astype(out_ref.dtype)


def pallas_roipool(feat, rois, spatial_scale, *, res=7):
    """feat: (B,H,W,C) NHWC; rois: (R,5) [batch_idx, x1, y1, x2, y2].
    Returns lane-dense (R, res*res*C) pooled features (bf16)."""
    B, H, W, C = feat.shape
    R = rois.shape[0]
    bidx = rois[:, 0].astype(jnp.int32)
    box = jnp.round(rois[:, 1:5] * spatial_scale).astype(jnp.int32)
    # TODO(synk): at realistic feature-map sizes DMA only each roi's bounding
    # window (manual make_async_copy) instead of the whole per-image slice.
    out = pl.pallas_call(
        functools.partial(_roipool_kernel, res=res),
        out_shape=jax.ShapeDtypeStruct((R, res, res * C), jnp.bfloat16),
        grid_spec=pltpu.PrefetchScalarGridSpec(
            num_scalar_prefetch=2,
            grid=(R,),
            in_specs=[pl.BlockSpec((1, H, W, C), lambda r, bi, bx: (bi[r], 0, 0, 0))],
            out_specs=pl.BlockSpec((1, res, res * C), lambda r, bi, bx: (r, 0, 0)),
        ),
        compiler_params=pltpu.CompilerParams(dimension_semantics=("parallel",)),
    )(bidx, box, feat)
    return out.reshape(R, res * res * C)


# ----------------------------------------------------------------------------
# JAX glue (box arithmetic, deterministic roi stand-in)
# ----------------------------------------------------------------------------
def bbox_transform(boxes, deltas, weights=(10.0, 10.0, 5.0, 5.0)):
    wx, wy, ww, wh = weights
    widths = boxes[:, 2] - boxes[:, 0] + 1.0
    heights = boxes[:, 3] - boxes[:, 1] + 1.0
    ctr_x = boxes[:, 0] + 0.5 * widths
    ctr_y = boxes[:, 1] + 0.5 * heights
    dx = deltas[:, 0::4] / wx
    dy = deltas[:, 1::4] / wy
    bound = jnp.log(1000.0 / 16.0)
    dw = jnp.minimum(deltas[:, 2::4] / ww, bound)
    dh = jnp.minimum(deltas[:, 3::4] / wh, bound)
    pred_ctr_x = dx * widths[:, None] + ctr_x[:, None]
    pred_ctr_y = dy * heights[:, None] + ctr_y[:, None]
    pred_w = jnp.exp(dw) * widths[:, None]
    pred_h = jnp.exp(dh) * heights[:, None]
    pred = jnp.zeros_like(deltas)
    pred = pred.at[:, 0::4].set(pred_ctr_x - 0.5 * pred_w)
    pred = pred.at[:, 1::4].set(pred_ctr_y - 0.5 * pred_h)
    pred = pred.at[:, 2::4].set(pred_ctr_x + 0.5 * pred_w - 1.0)
    pred = pred.at[:, 3::4].set(pred_ctr_y + 0.5 * pred_h - 1.0)
    return pred


def clip_tiled_boxes(boxes, im_h, im_w):
    """Per-roi clip bounds (im_h/im_w are (R,) vectors)."""
    im_h = im_h[:, None]
    im_w = im_w[:, None]
    boxes = boxes.at[:, 0::4].set(jnp.clip(boxes[:, 0::4], 0.0, im_w - 1.0))
    boxes = boxes.at[:, 1::4].set(jnp.clip(boxes[:, 1::4], 0.0, im_h - 1.0))
    boxes = boxes.at[:, 2::4].set(jnp.clip(boxes[:, 2::4], 0.0, im_w - 1.0))
    boxes = boxes.at[:, 3::4].set(jnp.clip(boxes[:, 3::4], 0.0, im_h - 1.0))
    return boxes


def make_rois(batch, im_h, im_w, per_im=8):
    # TODO(synk): deterministic stand-in for anchor/NMS proposal generation.
    rows = []
    for b in range(batch):
        for k in range(per_im):
            x1 = (k * 3) % (im_w // 2)
            y1 = (k * 5) % (im_h // 2)
            x2 = min(im_w - 1, x1 + 8 + 2 * k)
            y2 = min(im_h - 1, y1 + 8 + k)
            rows.append([float(b), float(x1), float(y1), float(x2), float(y2)])
    return jnp.array(rows, dtype=jnp.float32)


# ----------------------------------------------------------------------------
# Model
# ----------------------------------------------------------------------------
class GeneralizedRCNNPallas:
    NUM_CLASSES = 9
    NUM_ANCHORS = 3
    MLP_DIM = 256
    ROI_RES = 7

    def __init__(self, key, in_ch=3):
        ks = list(jax.random.split(key, 16))

        def w(k, shape):
            fan_in = 1
            for d in shape[1:] if len(shape) == 4 else shape[:1]:
                fan_in *= d
            return jax.random.normal(k, shape, dtype=jnp.float32) / jnp.sqrt(float(fan_in))

        # Conv_Body (VGG-ish, dim_out=32, spatial_scale=1/4)
        self.w1 = w(ks[0], (16, in_ch, 3, 3)); self.b1 = jnp.zeros((16,), jnp.float32)
        self.w2 = w(ks[1], (32, 16, 3, 3));    self.b2 = jnp.zeros((32,), jnp.float32)
        # RPN head
        self.w_rpn = w(ks[2], (32, 32, 3, 3)); self.b_rpn = jnp.zeros((32,), jnp.float32)
        self.w_rpn_cls = w(ks[3], (32, self.NUM_ANCHORS))
        self.b_rpn_cls = jnp.zeros((self.NUM_ANCHORS,), jnp.float32)
        self.w_rpn_bbox = w(ks[4], (32, self.NUM_ANCHORS * 4))
        self.b_rpn_bbox = jnp.zeros((self.NUM_ANCHORS * 4,), jnp.float32)
        # Box_Head (roi_2mlp_head)
        fc_in = 32 * self.ROI_RES * self.ROI_RES
        self.w_fc6 = w(ks[5], (fc_in, self.MLP_DIM)); self.b_fc6 = jnp.zeros((self.MLP_DIM,), jnp.float32)
        self.w_fc7 = w(ks[6], (self.MLP_DIM, self.MLP_DIM)); self.b_fc7 = jnp.zeros((self.MLP_DIM,), jnp.float32)
        # Box_Outs (fast_rcnn_outputs)
        self.w_cls = w(ks[7], (self.MLP_DIM, self.NUM_CLASSES))
        self.b_cls = jnp.zeros((self.NUM_CLASSES,), jnp.float32)
        self.w_bbox = w(ks[8], (self.MLP_DIM, self.NUM_CLASSES * 4))
        self.b_bbox = jnp.zeros((self.NUM_CLASSES * 4,), jnp.float32)

    def __call__(self, data_nchw, im_info):
        # data_nchw: (B, C, H, W) float32 (PyTorch convention); im_info: (B,3)=[h,w,scale]
        x = jnp.transpose(data_nchw, (0, 2, 3, 1)).astype(jnp.float32)  # NHWC

        # ---- Conv_Body: two fused conv3x3+ReLU+maxpool2x2 stages ----
        c1 = conv3x3(x, self.w1, self.b1, pool=True)             # (B, H/2, W/2, 16)
        blob_conv = conv3x3(c1, self.w2, self.b2, pool=True)     # (B, H/4, W/4, 32)
        spatial_scale = 0.25

        # ---- RPN head: conv3x3+ReLU, fused 1x1 cls+bbox heads (one matmul) ----
        rpn_conv = conv3x3(blob_conv, self.w_rpn, self.b_rpn, pool=False)
        flat = rpn_conv.reshape(-1, rpn_conv.shape[-1])
        w_rpn_heads = jnp.concatenate([self.w_rpn_cls, self.w_rpn_bbox], axis=1)
        b_rpn_heads = jnp.concatenate([self.b_rpn_cls, self.b_rpn_bbox], axis=0)
        rpn_out = pallas_linear(flat, w_rpn_heads, b_rpn_heads)
        rpn_cls_logits = rpn_out[:, :self.NUM_ANCHORS]
        rpn_bbox_pred = rpn_out[:, self.NUM_ANCHORS:]

        B = x.shape[0]
        im_h = int(im_info[0, 0]); im_w = int(im_info[0, 1])
        rois = make_rois(B, im_h, im_w)                          # (R, 5)
        R = rois.shape[0]

        # ---- Box_Head (RoIPoolF, separable) + fused 2-MLP + Box_Outs + softmax ----
        pooled = pallas_roipool(blob_conv, rois, spatial_scale, res=self.ROI_RES)
        w_out = jnp.concatenate([self.w_cls, self.w_bbox], axis=1)
        b_out = jnp.concatenate([self.b_cls, self.b_bbox], axis=0)
        head_out = pallas_box_head(pooled, self.w_fc6, self.b_fc6,
                                   self.w_fc7, self.b_fc7, w_out, b_out,
                                   num_classes=self.NUM_CLASSES)
        cls_prob = head_out[:, :self.NUM_CLASSES]
        bbox_pred = head_out[:, self.NUM_CLASSES:]

        # ---- prepare_det_rois (per-image clip; no NMS / threshold retry loop) ----
        bidx = rois[:, 0].astype(jnp.int32)
        scales = im_info[bidx, 2]
        im_boxes = rois[:, 1:5] / scales[:, None]
        pred_boxes = bbox_transform(im_boxes, bbox_pred)
        pred_boxes = clip_tiled_boxes(pred_boxes,
                                      im_info[bidx, 0] / scales,
                                      im_info[bidx, 1] / scales)
        det_dists = cls_prob
        det_scores = jnp.max(cls_prob[:, 1:], axis=-1)
        det_labels = jnp.argmax(cls_prob[:, 1:], axis=-1) + 1
        det_rois = jnp.concatenate([rois[:, :1], im_boxes * scales[:, None]], axis=1)
        det_boxes_all = pred_boxes.reshape(R, self.NUM_CLASSES, 4)

        return {
            "det_rois": det_rois,
            "det_dists": det_dists,
            "det_scores": det_scores,
            "det_labels": det_labels,
            "det_boxes_all": det_boxes_all,
            "blob_conv": blob_conv,
            "rpn_cls_logits": rpn_cls_logits,
            "rpn_bbox_pred": rpn_bbox_pred,
        }


# ----------------------------------------------------------------------------
if __name__ == "__main__":
    key = jax.random.PRNGKey(0)
    k_data, k_model = jax.random.split(key)

    B, C, H, W = 2, 3, 32, 32
    data = jax.random.normal(k_data, (B, C, H, W), dtype=jnp.float32)
    im_info = jnp.array([[H, W, 1.0], [H, W, 1.0]], dtype=jnp.float32)

    model = GeneralizedRCNNPallas(k_model, in_ch=C)
    out = model(data, im_info)

    jax.block_until_ready(out["det_dists"])
    jax.block_until_ready(out["det_boxes_all"])
    jax.block_until_ready(out["blob_conv"])

    assert out["det_rois"].shape == (16, 5)
    assert out["det_dists"].shape == (16, GeneralizedRCNNPallas.NUM_CLASSES)
    assert out["det_boxes_all"].shape == (16, GeneralizedRCNNPallas.NUM_CLASSES, 4)
    assert out["blob_conv"].shape == (B, H // 4, W // 4, 32)
    print("KERNEL_OK")
</pallas_src>

<mosaic_0001>
module attributes {stable_mosaic.version = 11 : i64} {
  func.func @_conv_kernel(%arg0: i32, %arg1: i32, %arg2: memref<1x1156x3xf32, #tpu.memory_space<vmem>>, %arg3: memref<9x3x16xbf16, #tpu.memory_space<vmem>>, %arg4: memref<1x16xf32, #tpu.memory_space<vmem>>, %arg5: memref<1x1x16x16xbf16, #tpu.memory_space<vmem>>, %arg6: memref<32x16xf32, #tpu.memory_space<vmem>>) attributes {dimension_semantics = [#tpu.dimension_semantics<parallel>, #tpu.dimension_semantics<parallel>], iteration_bounds = array<i64: 2, 16>, scalar_prefetch = 0 : i64, scratch_operands = 1 : i64, tpu.core_type = #tpu.core_type<tc>, window_params = [{transform_indices = @transform_0, window_bounds = array<i64: 1, 1156, 3>}, {pipeline_mode = #tpu.pipeline_mode<synchronous>, transform_indices = @transform_1, window_bounds = array<i64: 9, 3, 16>}, {pipeline_mode = #tpu.pipeline_mode<synchronous>, transform_indices = @transform_2, window_bounds = array<i64: 1, 16>}, {transform_indices = @transform_3, window_bounds = array<i64: 1, 1, 16, 16>}]} {
    %c0 = arith.constant 0 : index
    %c0_0 = arith.constant 0 : index
    %0 = vector.load %arg4[%c0, %c0_0] : memref<1x16xf32, #tpu.memory_space<vmem>>, vector<1x16xf32>
    %c2_i32 = arith.constant 2 : i32
    %1 = arith.muli %c2_i32, %arg1 : i32
    %cst = arith.constant 0.000000e+00 : f32
    %2 = vector.broadcast %cst : f32 to vector<32x16xf32>
    %c0_i32 = arith.constant 0 : i32
    %3 = arith.addi %1, %c0_i32 : i32
    %c34_i32 = arith.constant 34 : i32
    %4 = arith.muli %3, %c34_i32 : i32
    %c0_i32_1 = arith.constant 0 : i32
    %5 = arith.addi %4, %c0_i32_1 : i32
    %c0_2 = arith.constant 0 : index
    %6 = arith.index_cast %5 : i32 to index
    %c0_3 = arith.constant 0 : index
    %7 = vector.load %arg2[%c0_2, %6, %c0_3] : memref<1x1156x3xf32, #tpu.memory_space<vmem>>, vector<1x32x3xf32>
    %8 = vector.shape_cast %7 : vector<1x32x3xf32> to vector<32x3xf32>
    %9 = arith.truncf %8 : vector<32x3xf32> to vector<32x3xbf16>
    %c0_4 = arith.constant 0 : index
    %c0_5 = arith.constant 0 : index
    %c0_6 = arith.constant 0 : index
    %10 = vector.load %arg3[%c0_4, %c0_5, %c0_6] : memref<9x3x16xbf16, #tpu.memory_space<vmem>>, vector<1x3x16xbf16>
    %11 = vector.shape_cast %10 : vector<1x3x16xbf16> to vector<3x16xbf16>
    %cst_7 = arith.constant dense<0.000000e+00> : vector<32x16xf32>
    %12 = tpu.matmul %9, %11, %cst_7 {dimension_numbers = #tpu.dot_dimension_numbers<[1], [0], [0], [1], [0, 0, 1, 1], [], []>} : vector<32x3xbf16>, vector<3x16xbf16>, vector<32x16xf32> -> vector<32x16xf32>
    %13 = arith.addf %2, %12 : vector<32x16xf32>
    %c0_i32_8 = arith.constant 0 : i32
    %14 = arith.addi %1, %c0_i32_8 : i32
    %c34_i32_9 = arith.constant 34 : i32
    %15 = arith.muli %14, %c34_i32_9 : i32
    %c1_i32 = arith.constant 1 : i32
    %16 = arith.addi %15, %c1_i32 : i32
    %c0_10 = arith.constant 0 : index
    %17 = arith.index_cast %16 : i32 to index
    %c0_11 = arith.constant 0 : index
    %18 = vector.load %arg2[%c0_10, %17, %c0_11] : memref<1x1156x3xf32, #tpu.memory_space<vmem>>, vector<1x32x3xf32>
    %19 = vector.shape_cast %18 : vector<1x32x3xf32> to vector<32x3xf32>
    %20 = arith.truncf %19 : vector<32x3xf32> to vector<32x3xbf16>
    %c1 = arith.constant 1 : index
    %c0_12 = arith.constant 0 : index
    %c0_13 = arith.constant 0 : index
    %21 = vector.load %arg3[%c1, %c0_12, %c0_13] : memref<9x3x16xbf16, #tpu.memory_space<vmem>>, vector<1x3x16xbf16>
    %22 = vector.shape_cast %21 : vector<1x3x16xbf16> to vector<3x16xbf16>
    %cst_14 = arith.constant dense<0.000000e+00> : vector<32x16xf32>
    %23 = tpu.matmul %20, %22, %cst_14 {dimension_numbers = #tpu.dot_dimension_numbers<[1], [0], [0], [1], [0, 0, 1, 1], [], []>} : vector<32x3xbf16>, vector<3x16xbf16>, vector<32x16xf32> -> vector<32x16xf32>
    %24 = arith.addf %13, %23 : vector<32x16xf32>
    %c0_i32_15 = arith.constant 0 : i32
    %25 = arith.addi %1, %c0_i32_15 : i32
    %c34_i32_16 = arith.constant 34 : i32
    %26 = arith.muli %25, %c34_i32_16 : i32
    %c2_i32_17 = arith.constant 2 : i32
    %27 = arith.addi %26, %c2_i32_17 : i32
    %c0_18 = arith.constant 0 : index
    %28 = arith.index_cast %27 : i32 to index
    %c0_19 = arith.constant 0 : index
    %29 = vector.load %arg2[%c0_18, %28, %c0_19] : memref<1x1156x3xf32, #tpu.memory_space<vmem>>, vector<1x32x3xf32>
    %30 = vector.shape_cast %29 : vector<1x32x3xf32> to vector<32x3xf32>
    %31 = arith.truncf %30 : vector<32x3xf32> to vector<32x3xbf16>
    %c2 = arith.constant 2 : index
    %c0_20 = arith.constant 0 : index
    %c0_21 = arith.constant 0 : index
    %32 = vector.load %arg3[%c2, %c0_20, %c0_21] : memref<9x3x16xbf16, #tpu.memory_space<vmem>>, vector<1x3x16xbf16>
    %33 = vector.shape_cast %32 : vector<1x3x16xbf16> to vector<3x16xbf16>
    %cst_22 = arith.constant dense<0.000000e+00> : vector<32x16xf32>
    %34 = tpu.matmul %31, %33, %cst_22 {dimension_numbers = #tpu.dot_dimension_numbers<[1], [0], [0], [1], [0, 0, 1, 1], [], []>} : vector<32x3xbf16>, vector<3x16xbf16>, vector<32x16xf32> -> vector<32x16xf32>
    %35 = arith.addf %24, %34 : vector<32x16xf32>
    %c1_i32_23 = arith.constant 1 : i32
    %36 = arith.addi %1, %c1_i32_23 : i32
    %c34_i32_24 = arith.constant 34 : i32
    %37 = arith.muli %36, %c34_i32_24 : i32
    %c0_i32_25 = arith.constant 0 : i32
    %38 = arith.addi %37, %c0_i32_25 : i32
    %c0_26 = arith.constant 0 : index
    %39 = arith.index_cast %38 : i32 to index
    %c0_27 = arith.constant 0 : index
    %40 = vector.load %arg2[%c0_26, %39, %c0_27] : memref<1x1156x3xf32, #tpu.memory_space<vmem>>, vector<1x32x3xf32>
    %41 = vector.shape_cast %40 : vector<1x32x3xf32> to vector<32x3xf32>
    %42 = arith.truncf %41 : vector<32x3xf32> to vector<32x3xbf16>
    %c3 = arith.constant 3 : index
    %c0_28 = arith.constant 0 : index
    %c0_29 = arith.constant 0 : index
    %43 = vector.load %arg3[%c3, %c0_28, %c0_29] : memref<9x3x16xbf16, #tpu.memory_space<vmem>>, vector<1x3x16xbf16>
    %44 = vector.shape_cast %43 : vector<1x3x16xbf16> to vector<3x16xbf16>
    %cst_30 = arith.constant dense<0.000000e+00> : vector<32x16xf32>
    %45 = tpu.matmul %42, %44, %cst_30 {dimension_numbers = #tpu.dot_dimension_numbers<[1], [0], [0], [1], [0, 0, 1, 1], [], []>} : vector<32x3xbf16>, vector<3x16xbf16>, vector<32x16xf32> -> vector<32x16xf32>
    %46 = arith.addf %35, %45 : vector<32x16xf32>
    %c1_i32_31 = arith.constant 1 : i32
    %47 = arith.addi %1, %c1_i32_31 : i32
    %c34_i32_32 = arith.constant 34 : i32
    %48 = arith.muli %47, %c34_i32_32 : i32
    %c1_i32_33 = arith.constant 1 : i32
    %49 = arith.addi %48, %c1_i32_33 : i32
    %c0_34 = arith.constant 0 : index
    %50 = arith.index_cast %49 : i32 to index
    %c0_35 = arith.constant 0 : index
    %51 = vector.load %arg2[%c0_34, %50, %c0_35] : memref<1x1156x3xf32, #tpu.memory_space<vmem>>, vector<1x32x3xf32>
    %52 = vector.shape_cast %51 : vector<1x32x3xf32> to vector<32x3xf32>
    %53 = arith.truncf %52 : vector<32x3xf32> to vector<32x3xbf16>
    %c4 = arith.constant 4 : index
    %c0_36 = arith.constant 0 : index
    %c0_37 = arith.constant 0 : index
    %54 = vector.load %arg3[%c4, %c0_36, %c0_37] : memref<9x3x16xbf16, #tpu.memory_space<vmem>>, vector<1x3x16xbf16>
    %55 = vector.shape_cast %54 : vector<1x3x16xbf16> to vector<3x16xbf16>
    %cst_38 = arith.constant dense<0.000000e+00> : vector<32x16xf32>
    %56 = tpu.matmul %53, %55, %cst_38 {dimension_numbers = #tpu.dot_dimension_numbers<[1], [0], [0], [1], [0, 0, 1, 1], [], []>} : vector<32x3xbf16>, vector<3x16xbf16>, vector<32x16xf32> -> vector<32x16xf32>
    %57 = arith.addf %46, %56 : vector<32x16xf32>
    %c1_i32_39 = arith.constant 1 : i32
    %58 = arith.addi %1, %c1_i32_39 : i32
    %c34_i32_40 = arith.constant 34 : i32
    %59 = arith.muli %58, %c34_i32_40 : i32
    %c2_i32_41 = arith.constant 2 : i32
    %60 = arith.addi %59, %c2_i32_41 : i32
    %c0_42 = arith.constant 0 : index
    %61 = arith.index_cast %60 : i32 to index
    %c0_43 = arith.constant 0 : index
    %62 = vector.load %arg2[%c0_42, %61, %c0_43] : memref<1x1156x3xf32, #tpu.memory_space<vmem>>, vector<1x32x3xf32>
    %63 = vector.shape_cast %62 : vector<1x32x3xf32> to vector<32x3xf32>
    %64 = arith.truncf %63 : vector<32x3xf32> to vector<32x3xbf16>
    %c5 = arith.constant 5 : index
    %c0_44 = arith.constant 0 : index
    %c0_45 = arith.constant 0 : index
    %65 = vector.load %arg3[%c5, %c0_44, %c0_45] : memref<9x3x16xbf16, #tpu.memory_space<vmem>>, vector<1x3x16xbf16>
    %66 = vector.shape_cast %65 : vector<1x3x16xbf16> to vector<3x16xbf16>
    %cst_46 = arith.constant dense<0.000000e+00> : vector<32x16xf32>
    %67 = tpu.matmul %64, %66, %cst_46 {dimension_numbers = #tpu.dot_dimension_numbers<[1], [0], [0], [1], [0, 0, 1, 1], [], []>} : vector<32x3xbf16>, vector<3x16xbf16>, vector<32x16xf32> -> vector<32x16xf32>
    %68 = arith.addf %57, %67 : vector<32x16xf32>
    %c2_i32_47 = arith.constant 2 : i32
    %69 = arith.addi %1, %c2_i32_47 : i32
    %c34_i32_48 = arith.constant 34 : i32
    %70 = arith.muli %69, %c34_i32_48 : i32
    %c0_i32_49 = arith.constant 0 : i32
    %71 = arith.addi %70, %c0_i32_49 : i32
    %c0_50 = arith.constant 0 : index
    %72 = arith.index_cast %71 : i32 to index
    %c0_51 = arith.constant 0 : index
    %73 = vector.load %arg2[%c0_50, %72, %c0_51] : memref<1x1156x3xf32, #tpu.memory_space<vmem>>, vector<1x32x3xf32>
    %74 = vector.shape_cast %73 : vector<1x32x3xf32> to vector<32x3xf32>
    %75 = arith.truncf %74 : vector<32x3xf32> to vector<32x3xbf16>
    %c6 = arith.constant 6 : index
    %c0_52 = arith.constant 0 : index
    %c0_53 = arith.constant 0 : index
    %76 = vector.load %arg3[%c6, %c0_52, %c0_53] : memref<9x3x16xbf16, #tpu.memory_space<vmem>>, vector<1x3x16xbf16>
    %77 = vector.shape_cast %76 : vector<1x3x16xbf16> to vector<3x16xbf16>
    %cst_54 = arith.constant dense<0.000000e+00> : vector<32x16xf32>
    %78 = tpu.matmul %75, %77, %cst_54 {dimension_numbers = #tpu.dot_dimension_numbers<[1], [0], [0], [1], [0, 0, 1, 1], [], []>} : vector<32x3xbf16>, vector<3x16xbf16>, vector<32x16xf32> -> vector<32x16xf32>
    %79 = arith.addf %68, %78 : vector<32x16xf32>
    %c2_i32_55 = arith.constant 2 : i32
    %80 = arith.addi %1, %c2_i32_55 : i32
    %c34_i32_56 = arith.constant 34 : i32
    %81 = arith.muli %80, %c34_i32_56 : i32
    %c1_i32_57 = arith.constant 1 : i32
    %82 = arith.addi %81, %c1_i32_57 : i32
    %c0_58 = arith.constant 0 : index
    %83 = arith.index_cast %82 : i32 to index
    %c0_59 = arith.constant 0 : index
    %84 = vector.load %arg2[%c0_58, %83, %c0_59] : memref<1x1156x3xf32, #tpu.memory_space<vmem>>, vector<1x32x3xf32>
    %85 = vector.shape_cast %84 : vector<1x32x3xf32> to vector<32x3xf32>
    %86 = arith.truncf %85 : vector<32x3xf32> to vector<32x3xbf16>
    %c7 = arith.constant 7 : index
    %c0_60 = arith.constant 0 : index
    %c0_61 = arith.constant 0 : index
    %87 = vector.load %arg3[%c7, %c0_60, %c0_61] : memref<9x3x16xbf16, #tpu.memory_space<vmem>>, vector<1x3x16xbf16>
    %88 = vector.shape_cast %87 : vector<1x3x16xbf16> to vector<3x16xbf16>
    %cst_62 = arith.constant dense<0.000000e+00> : vector<32x16xf32>
    %89 = tpu.matmul %86, %88, %cst_62 {dimension_numbers = #tpu.dot_dimension_numbers<[1], [0], [0], [1], [0, 0, 1, 1], [], []>} : vector<32x3xbf16>, vector<3x16xbf16>, vector<32x16xf32> -> vector<32x16xf32>
    %90 = arith.addf %79, %89 : vector<32x16xf32>
    %c2_i32_63 = arith.constant 2 : i32
    %91 = arith.addi %1, %c2_i32_63 : i32
    %c34_i32_64 = arith.constant 34 : i32
    %92 = arith.muli %91, %c34_i32_64 : i32
    %c2_i32_65 = arith.constant 2 : i32
    %93 = arith.addi %92, %c2_i32_65 : i32
    %c0_66 = arith.constant 0 : index
    %94 = arith.index_cast %93 : i32 to index
    %c0_67 = arith.constant 0 : index
    %95 = vector.load %arg2[%c0_66, %94, %c0_67] : memref<1x1156x3xf32, #tpu.memory_space<vmem>>, vector<1x32x3xf32>
    %96 = vector.shape_cast %95 : vector<1x32x3xf32> to vector<32x3xf32>
    %97 = arith.truncf %96 : vector<32x3xf32> to vector<32x3xbf16>
    %c8 = arith.constant 8 : index
    %c0_68 = arith.constant 0 : index
    %c0_69 = arith.constant 0 : index
    %98 = vector.load %arg3[%c8, %c0_68, %c0_69] : memref<9x3x16xbf16, #tpu.memory_space<vmem>>, vector<1x3x16xbf16>
    %99 = vector.shape_cast %98 : vector<1x3x16xbf16> to vector<3x16xbf16>
    %cst_70 = arith.constant dense<0.000000e+00> : vector<32x16xf32>
    %100 = tpu.matmul %97, %99, %cst_70 {dimension_numbers = #tpu.dot_dimension_numbers<[1], [0], [0], [1], [0, 0, 1, 1], [], []>} : vector<32x3xbf16>, vector<3x16xbf16>, vector<32x16xf32> -> vector<32x16xf32>
    %101 = arith.addf %90, %100 : vector<32x16xf32>
    %c2_i32_71 = arith.constant 2 : i32
    %102 = arith.muli %c2_i32_71, %arg1 : i32
    %c1_i32_72 = arith.constant 1 : i32
    %103 = arith.addi %102, %c1_i32_72 : i32
    %cst_73 = arith.constant 0.000000e+00 : f32
    %104 = vector.broadcast %cst_73 : f32 to vector<32x16xf32>
    %c0_i32_74 = arith.constant 0 : i32
    %105 = arith.addi %103, %c0_i32_74 : i32
    %c34_i32_75 = arith.constant 34 : i32
    %106 = arith.muli %105, %c34_i32_75 : i32
    %c0_i32_76 = arith.constant 0 : i32
    %107 = arith.addi %106, %c0_i32_76 : i32
    %c0_77 = arith.constant 0 : index
    %108 = arith.index_cast %107 : i32 to index
    %c0_78 = arith.constant 0 : index
    %109 = vector.load %arg2[%c0_77, %108, %c0_78] : memref<1x1156x3xf32, #tpu.memory_space<vmem>>, vector<1x32x3xf32>
    %110 = vector.shape_cast %109 : vector<1x32x3xf32> to vector<32x3xf32>
    %111 = arith.truncf %110 : vector<32x3xf32> to vector<32x3xbf16>
    %c0_79 = arith.constant 0 : index
    %c0_80 = arith.constant 0 : index
    %c0_81 = arith.constant 0 : index
    %112 = vector.load %arg3[%c0_79, %c0_80, %c0_81] : memref<9x3x16xbf16, #tpu.memory_space<vmem>>, vector<1x3x16xbf16>
    %113 = vector.shape_cast %112 : vector<1x3x16xbf16> to vector<3x16xbf16>
    %cst_82 = arith.constant dense<0.000000e+00> : vector<32x16xf32>
    %114 = tpu.matmul %111, %113, %cst_82 {dimension_numbers = #tpu.dot_dimension_numbers<[1], [0], [0], [1], [0, 0, 1, 1], [], []>} : vector<32x3xbf16>, vector<3x16xbf16>, vector<32x16xf32> -> vector<32x16xf32>
    %115 = arith.addf %104, %114 : vector<32x16xf32>
    %c0_i32_83 = arith.constant 0 : i32
    %116 = arith.addi %103, %c0_i32_83 : i32
    %c34_i32_84 = arith.constant 34 : i32
    %117 = arith.muli %116, %c34_i32_84 : i32
    %c1_i32_85 = arith.constant 1 : i32
    %118 = arith.addi %117, %c1_i32_85 : i32
    %c0_86 = arith.constant 0 : index
    %119 = arith.index_cast %118 : i32 to index
    %c0_87 = arith.constant 0 : index
    %120 = vector.load %arg2[%c0_86, %119, %c0_87] : memref<1x1156x3xf32, #tpu.memory_space<vmem>>, vector<1x32x3xf32>
    %121 = vector.shape_cast %120 : vector<1x32x3xf32> to vector<32x3xf32>
    %122 = arith.truncf %121 : vector<32x3xf32> to vector<32x3xbf16>
    %c1_88 = arith.constant 1 : index
    %c0_89 = arith.constant 0 : index
    %c0_90 = arith.constant 0 : index
    %123 = vector.load %arg3[%c1_88, %c0_89, %c0_90] : memref<9x3x16xbf16, #tpu.memory_space<vmem>>, vector<1x3x16xbf16>
    %124 = vector.shape_cast %123 : vector<1x3x16xbf16> to vector<3x16xbf16>
    %cst_91 = arith.constant dense<0.000000e+00> : vector<32x16xf32>
    %125 = tpu.matmul %122, %124, %cst_91 {dimension_numbers = #tpu.dot_dimension_numbers<[1], [0], [0], [1], [0, 0, 1, 1], [], []>} : vector<32x3xbf16>, vector<3x16xbf16>, vector<32x16xf32> -> vector<32x16xf32>
    %126 = arith.addf %115, %125 : vector<32x16xf32>
    %c0_i32_92 = arith.constant 0 : i32
    %127 = arith.addi %103, %c0_i32_92 : i32
    %c34_i32_93 = arith.constant 34 : i32
    %128 = arith.muli %127, %c34_i32_93 : i32
    %c2_i32_94 = arith.constant 2 : i32
    %129 = arith.addi %128, %c2_i32_94 : i32
    %c0_95 = arith.constant 0 : index
    %130 = arith.index_cast %129 : i32 to index
    %c0_96 = arith.constant 0 : index
    %131 = vector.load %arg2[%c0_95, %130, %c0_96] : memref<1x1156x3xf32, #tpu.memory_space<vmem>>, vector<1x32x3xf32>
    %132 = vector.shape_cast %131 : vector<1x32x3xf32> to vector<32x3xf32>
    %133 = arith.truncf %132 : vector<32x3xf32> to vector<32x3xbf16>
    %c2_97 = arith.constant 2 : index
    %c0_98 = arith.constant 0 : index
    %c0_99 = arith.constant 0 : index
    %134 = vector.load %arg3[%c2_97, %c0_98, %c0_99] : memref<9x3x16xbf16, #tpu.memory_space<vmem>>, vector<1x3x16xbf16>
    %135 = vector.shape_cast %134 : vector<1x3x16xbf16> to vector<3x16xbf16>
    %cst_100 = arith.constant dense<0.000000e+00> : vector<32x16xf32>
    %136 = tpu.matmul %133, %135, %cst_100 {dimension_numbers = #tpu.dot_dimension_numbers<[1], [0], [0], [1], [0, 0, 1, 1], [], []>} : vector<32x3xbf16>, vector<3x16xbf16>, vector<32x16xf32> -> vector<32x16xf32>
    %137 = arith.addf %126, %136 : vector<32x16xf32>
    %c1_i32_101 = arith.constant 1 : i32
    %138 = arith.addi %103, %c1_i32_101 : i32
    %c34_i32_102 = arith.constant 34 : i32
    %139 = arith.muli %138, %c34_i32_102 : i32
    %c0_i32_103 = arith.constant 0 : i32
    %140 = arith.addi %139, %c0_i32_103 : i32
    %c0_104 = arith.constant 0 : index
    %141 = arith.index_cast %140 : i32 to index
    %c0_105 = arith.constant 0 : index
    %142 = vector.load %arg2[%c0_104, %141, %c0_105] : memref<1x1156x3xf32, #tpu.memory_space<vmem>>, vector<1x32x3xf32>
    %143 = vector.shape_cast %142 : vector<1x32x3xf32> to vector<32x3xf32>
    %144 = arith.truncf %143 : vector<32x3xf32> to vector<32x3xbf16>
    %c3_106 = arith.constant 3 : index
    %c0_107 = arith.constant 0 : index
    %c0_108 = arith.constant 0 : index
    %145 = vector.load %arg3[%c3_106, %c0_107, %c0_108] : memref<9x3x16xbf16, #tpu.memory_space<vmem>>, vector<1x3x16xbf16>
    %146 = vector.shape_cast %145 : vector<1x3x16xbf16> to vector<3x16xbf16>
    %cst_109 = arith.constant dense<0.000000e+00> : vector<32x16xf32>
    %147 = tpu.matmul %144, %146, %cst_109 {dimension_numbers = #tpu.dot_dimension_numbers<[1], [0], [0], [1], [0, 0, 1, 1], [], []>} : vector<32x3xbf16>, vector<3x16xbf16>, vector<32x16xf32> -> vector<32x16xf32>
    %148 = arith.addf %137, %147 : vector<32x16xf32>
    %c1_i32_110 = arith.constant 1 : i32
    %149 = arith.addi %103, %c1_i32_110 : i32
    %c34_i32_111 = arith.constant 34 : i32
    %150 = arith.muli %149, %c34_i32_111 : i32
    %c1_i32_112 = arith.constant 1 : i32
    %151 = arith.addi %150, %c1_i32_112 : i32
    %c0_113 = arith.constant 0 : index
    %152 = arith.index_cast %151 : i32 to index
    %c0_114 = arith.constant 0 : index
    %153 = vector.load %arg2[%c0_113, %152, %c0_114] : memref<1x1156x3xf32, #tpu.memory_space<vmem>>, vector<1x32x3xf32>
    %154 = vector.shape_cast %153 : vector<1x32x3xf32> to vector<32x3xf32>
    %155 = arith.truncf %154 : vector<32x3xf32> to vector<32x3xbf16>
    %c4_115 = arith.constant 4 : index
    %c0_116 = arith.constant 0 : index
    %c0_117 = arith.constant 0 : index
    %156 = vector.load %arg3[%c4_115, %c0_116, %c0_117] : memref<9x3x16xbf16, #tpu.memory_space<vmem>>, vector<1x3x16xbf16>
    %157 = vector.shape_cast %156 : vector<1x3x16xbf16> to vector<3x16xbf16>
    %cst_118 = arith.constant dense<0.000000e+00> : vector<32x16xf32>
    %158 = tpu.matmul %155, %157, %cst_118 {dimension_numbers = #tpu.dot_dimension_numbers<[1], [0], [0], [1], [0, 0, 1, 1], [], []>} : vector<32x3xbf16>, vector<3x16xbf16>, vector<32x16xf32> -> vector<32x16xf32>
    %159 = arith.addf %148, %158 : vector<32x16xf32>
    %c1_i32_119 = arith.constant 1 : i32
    %160 = arith.addi %103, %c1_i32_119 : i32
    %c34_i32_120 = arith.constant 34 : i32
    %161 = arith.muli %160, %c34_i32_120 : i32
    %c2_i32_121 = arith.constant 2 : i32
    %162 = arith.addi %161, %c2_i32_121 : i32
    %c0_122 = arith.constant 0 : index
    %163 = arith.index_cast %162 : i32 to index
    %c0_123 = arith.constant 0 : index
    %164 = vector.load %arg2[%c0_122, %163, %c0_123] : memref<1x1156x3xf32, #tpu.memory_space<vmem>>, vector<1x32x3xf32>
    %165 = vector.shape_cast %164 : vector<1x32x3xf32> to vector<32x3xf32>
    %166 = arith.truncf %165 : vector<32x3xf32> to vector<32x3xbf16>
    %c5_124 = arith.constant 5 : index
    %c0_125 = arith.constant 0 : index
    %c0_126 = arith.constant 0 : index
    %167 = vector.load %arg3[%c5_124, %c0_125, %c0_126] : memref<9x3x16xbf16, #tpu.memory_space<vmem>>, vector<1x3x16xbf16>
    %168 = vector.shape_cast %167 : vector<1x3x16xbf16> to vector<3x16xbf16>
    %cst_127 = arith.constant dense<0.000000e+00> : vector<32x16xf32>
    %169 = tpu.matmul %166, %168, %cst_127 {dimension_numbers = #tpu.dot_dimension_numbers<[1], [0], [0], [1], [0, 0, 1, 1], [], []>} : vector<32x3xbf16>, vector<3x16xbf16>, vector<32x16xf32> -> vector<32x16xf32>
    %170 = arith.addf %159, %169 : vector<32x16xf32>
    %c2_i32_128 = arith.constant 2 : i32
    %171 = arith.addi %103, %c2_i32_128 : i32
    %c34_i32_129 = arith.constant 34 : i32
    %172 = arith.muli %171, %c34_i32_129 : i32
    %c0_i32_130 = arith.constant 0 : i32
    %173 = arith.addi %172, %c0_i32_130 : i32
    %c0_131 = arith.constant 0 : index
    %174 = arith.index_cast %173 : i32 to index
    %c0_132 = arith.constant 0 : index
    %175 = vector.load %arg2[%c0_131, %174, %c0_132] : memref<1x1156x3xf32, #tpu.memory_space<vmem>>, vector<1x32x3xf32>
    %176 = vector.shape_cast %175 : vector<1x32x3xf32> to vector<32x3xf32>
    %177 = arith.truncf %176 : vector<32x3xf32> to vector<32x3xbf16>
    %c6_133 = arith.constant 6 : index
    %c0_134 = arith.constant 0 : index
    %c0_135 = arith.constant 0 : index
    %178 = vector.load %arg3[%c6_133, %c0_134, %c0_135] : memref<9x3x16xbf16, #tpu.memory_space<vmem>>, vector<1x3x16xbf16>
    %179 = vector.shape_cast %178 : vector<1x3x16xbf16> to vector<3x16xbf16>
    %cst_136 = arith.constant dense<0.000000e+00> : vector<32x16xf32>
    %180 = tpu.matmul %177, %179, %cst_136 {dimension_numbers = #tpu.dot_dimension_numbers<[1], [0], [0], [1], [0, 0, 1, 1], [], []>} : vector<32x3xbf16>, vector<3x16xbf16>, vector<32x16xf32> -> vector<32x16xf32>
    %181 = arith.addf %170, %180 : vector<32x16xf32>
    %c2_i32_137 = arith.constant 2 : i32
    %182 = arith.addi %103, %c2_i32_137 : i32
    %c34_i32_138 = arith.constant 34 : i32
    %183 = arith.muli %182, %c34_i32_138 : i32
    %c1_i32_139 = arith.constant 1 : i32
    %184 = arith.addi %183, %c1_i32_139 : i32
    %c0_140 = arith.constant 0 : index
    %185 = arith.index_cast %184 : i32 to index
    %c0_141 = arith.constant 0 : index
    %186 = vector.load %arg2[%c0_140, %185, %c0_141] : memref<1x1156x3xf32, #tpu.memory_space<vmem>>, vector<1x32x3xf32>
    %187 = vector.shape_cast %186 : vector<1x32x3xf32> to vector<32x3xf32>
    %188 = arith.truncf %187 : vector<32x3xf32> to vector<32x3xbf16>
    %c7_142 = arith.constant 7 : index
    %c0_143 = arith.constant 0 : index
    %c0_144 = arith.constant 0 : index
    %189 = vector.load %arg3[%c7_142, %c0_143, %c0_144] : memref<9x3x16xbf16, #tpu.memory_space<vmem>>, vector<1x3x16xbf16>
    %190 = vector.shape_cast %189 : vector<1x3x16xbf16> to vector<3x16xbf16>
    %cst_145 = arith.constant dense<0.000000e+00> : vector<32x16xf32>
    %191 = tpu.matmul %188, %190, %cst_145 {dimension_numbers = #tpu.dot_dimension_numbers<[1], [0], [0], [1], [0, 0, 1, 1], [], []>} : vector<32x3xbf16>, vector<3x16xbf16>, vector<32x16xf32> -> vector<32x16xf32>
    %192 = arith.addf %181, %191 : vector<32x16xf32>
    %c2_i32_146 = arith.constant 2 : i32
    %193 = arith.addi %103, %c2_i32_146 : i32
    %c34_i32_147 = arith.constant 34 : i32
    %194 = arith.muli %193, %c34_i32_147 : i32
    %c2_i32_148 = arith.constant 2 : i32
    %195 = arith.addi %194, %c2_i32_148 : i32
    %c0_149 = arith.constant 0 : index
    %196 = arith.index_cast %195 : i32 to index
    %c0_150 = arith.constant 0 : index
    %197 = vector.load %arg2[%c0_149, %196, %c0_150] : memref<1x1156x3xf32, #tpu.memory_space<vmem>>, vector<1x32x3xf32>
    %198 = vector.shape_cast %197 : vector<1x32x3xf32> to vector<32x3xf32>
    %199 = arith.truncf %198 : vector<32x3xf32> to vector<32x3xbf16>
    %c8_151 = arith.constant 8 : index
    %c0_152 = arith.constant 0 : index
    %c0_153 = arith.constant 0 : index
    %200 = vector.load %arg3[%c8_151, %c0_152, %c0_153] : memref<9x3x16xbf16, #tpu.memory_space<vmem>>, vector<1x3x16xbf16>
    %201 = vector.shape_cast %200 : vector<1x3x16xbf16> to vector<3x16xbf16>
    %cst_154 = arith.constant dense<0.000000e+00> : vector<32x16xf32>
    %202 = tpu.matmul %199, %201, %cst_154 {dimension_numbers = #tpu.dot_dimension_numbers<[1], [0], [0], [1], [0, 0, 1, 1], [], []>} : vector<32x3xbf16>, vector<3x16xbf16>, vector<32x16xf32> -> vector<32x16xf32>
    %203 = arith.addf %192, %202 : vector<32x16xf32>
    %204 = arith.maximumf %101, %203 : vector<32x16xf32>
    %205 = vector.broadcast %0 : vector<1x16xf32> to vector<32x16xf32>
    %206 = arith.addf %204, %205 : vector<32x16xf32>
    %cst_155 = arith.constant 0.000000e+00 : f32
    %207 = vector.broadcast %cst_155 : f32 to vector<32x16xf32>
    %208 = arith.maximumf %206, %207 : vector<32x16xf32>
    %c0_156 = arith.constant 0 : index
    %c0_157 = arith.constant 0 : index
    %209 = vector.load %arg6[%c0_156, %c0_157] : memref<32x16xf32, #tpu.memory_space<vmem>>, vector<32x16xf32>
    tpu.vector_store %arg6[%c0_156, %c0_157], %208 {strides = array<i32>} : memref<32x16xf32, #tpu.memory_space<vmem>>, vector<32x16xf32>,
    %c0_158 = arith.constant 0 : index
    %c0_159 = arith.constant 0 : index
    %210 = tpu.strided_load %arg6[%c0_158, %c0_159] {strides = array<i32: 2, 1>} : memref<32x16xf32, #tpu.memory_space<vmem>>, vector<16x16xf32>
    %c1_160 = arith.constant 1 : index
    %c0_161 = arith.constant 0 : index
    %211 = tpu.strided_load %arg6[%c1_160, %c0_161] {strides = array<i32: 2, 1>} : memref<32x16xf32, #tpu.memory_space<vmem>>, vector<16x16xf32>
    %212 = arith.maximumf %210, %211 : vector<16x16xf32>
    %213 = arith.truncf %212 : vector<16x16xf32> to vector<16x16xbf16>
    %c0_162 = arith.constant 0 : index
    %c0_163 = arith.constant 0 : index
    %c0_164 = arith.constant 0 : index
    %c0_165 = arith.constant 0 : index
    %214 = vector.load %arg5[%c0_162, %c0_163, %c0_164, %c0_165] : memref<1x1x16x16xbf16, #tpu.memory_space<vmem>>, vector<1x1x16x16xbf16>
    %215 = vector.shape_cast %214 : vector<1x1x16x16xbf16> to vector<16x16xbf16>
    %216 = vector.shape_cast %213 : vector<16x16xbf16> to vector<1x1x16x16xbf16>
    tpu.vector_store %arg5[%c0_162, %c0_163, %c0_164, %c0_165], %216 {strides = array<i32>} : memref<1x1x16x16xbf16, #tpu.memory_space<vmem>>, vector<1x1x16x16xbf16>,
    return
  }
  func.func @transform_0(%arg0: i32, %arg1: i32) -> (i32, i32, i32) {
    %c0_i32 = arith.constant 0 : i32
    %c0_i32_0 = arith.constant 0 : i32
    %c0_i32_1 = arith.constant 0 : i32
    return %arg0, %c0_i32, %c0_i32_0 : i32, i32, i32
  }
  func.func @transform_1(%arg0: i32, %arg1: i32) -> (i32, i32, i32) {
    %c0_i32 = arith.constant 0 : i32
    %c0_i32_0 = arith.constant 0 : i32
    %c0_i32_1 = arith.constant 0 : i32
    %c0_i32_2 = arith.constant 0 : i32
    return %c0_i32, %c0_i32_0, %c0_i32_1 : i32, i32, i32
  }
  func.func @transform_2(%arg0: i32, %arg1: i32) -> (i32, i32) {
    %c0_i32 = arith.constant 0 : i32
    %c0_i32_0 = arith.constant 0 : i32
    %c0_i32_1 = arith.constant 0 : i32
    return %c0_i32, %c0_i32_0 : i32, i32
  }
  func.func @transform_3(%arg0: i32, %arg1: i32) -> (i32, i32, i32, i32) {
    %c0_i32 = arith.constant 0 : i32
    %c0_i32_0 = arith.constant 0 : i32
    %c0_i32_1 = arith.constant 0 : i32
    return %arg0, %arg1, %c0_i32, %c0_i32_0 : i32, i32, i32, i32
  }
}

</mosaic_0001>

<bundles_post_ra>
// kernel: tpu_custom_call.1
= control target key start
LH: loop header
LB: loop body
LE: loop exit
PB: predicated region body
PF: predicated region fallthrough
CT: control target
= control target key end

     0   :  { %8 = vsyncpa [#allocation4], 0  ;;  %s2342_s0 = inlined_call_operand.vmem [shape: f32[2,1156,3], index: 0, kind: input, shape index: {}]   ;;  %s2343_s1 = inlined_call_operand.vmem [shape: bf16[9,3,16], index: 1, kind: input, shape index: {}]   ;;  %s2344_s2 = inlined_call_operand.vmem [shape: f32[1,16], index: 2, kind: input, shape index: {}]   ;;  %s2345_s3 = inlined_call_operand.hbm [shape: bf16[2,16,16,16], index: 3, kind: output, shape index: {}]  }
   0x1   :  { %10 = vsyncpa [#allocation4 + $0x1], 0  ;;  %s2068_s12 = smov 0   ;;  %s2070_s13 = smov 0  }
   0x2   :  { %s2072_s14 = smov 0   ;;  %s2074_s15 = smov 0  }
   0x3   :  { %s2076_s16 = smov 0   ;;  %s2078_s17 = smov 0  }
   0x4   :  { %s2080_s18 = smov 0   ;;  %s2082_s19 = smov 0  }
   0x5 LB: > { %s1523_s20 = sadd.s32 4294967295, %s2042_s19   ;;  %s1524_s21 = sadd.s32 4294967294, %s2042_s19   ;;  %s2042_s19 = sphi %s2082_s19, %s16_s19   ;;  %s2038_s18 = sphi %s2080_s18, %s2354_s18   ;;  %s2034_s17 = sphi %s2078_s17, %s2353_s17   ;;  %s2030_s16 = sphi %s2076_s16, %s2352_s16   ;;  %s2026_s15 = sphi %s2074_s15, %s2351_s15   ;;  %s2022_s14 = sphi %s2072_s14, %s2350_s14   ;;  %s2018_s13 = sphi %s2070_s13, %s2349_s13   ;;  %s2014_s12 = sphi %s2068_s12, %s2348_s12  }
   0x6   : > { %s25_s22 = sadd.s32 1, %s2034_s17  ;;  %s28_s23 = sadd.s32 1, %s2038_s18 }
   0x7   : > { %p26_p0 = scmp.ge.s32.totalorder %s25_s22, 16  ;;  %p115_p1 = scmp.ne.s32.totalorder %s2022_s14, %s2018_s13 }
   0x8   : > { %p116_p2 = scmp.eq.s32.totalorder %s1523_s20, 31  ;;  %p121_p5 = scmp.ne.s32.totalorder %s2018_s13, %s2014_s12 }
   0x9   : > { %s2356_s22 = smov (%p26_p0, %s25_s22), 0  ;;  %s2358_s23 = smov (!%p26_p0, %s28_s23), %s2038_s18 }
   0xa   : > { %s101_s24 = ssub.s32 %s2034_s17, %s2356_s22  ;;  %p2119_p3 = por %p116_p2, %p115_p1 }
   0xb   : > { %p30_p4 = scmp.ge.s32.totalorder %s2358_s23, 2  ;;  %p122_p6 = scmp.eq.s32.totalorder %s1524_s21, 31 }
   0xc   : > { %p1527_p7 = scmp.ge.s32.totalorder %s2042_s19, 1  ;;  %p154_p9 = scmp.lt.s32.totalorder %s2042_s19, 33 }
   0xd   : > { %s2360_s23 = smov (%p30_p4, %s2358_s23), 0  ;;  %p2128_p8 = por %p122_p6, %p121_p5 }
   0xe   : > { %s100_s27 = ssub.s32 %s2038_s18, %s2360_s23  ;;  %s105_s28 = sadd.s32 1, %s2022_s14 }
   0xf   : > { %s102_s29 = sor.u32 %s101_s24, %s100_s27  ;;  %p155_p10 = pnand %p1527_p7, %p154_p9 }
  0x10   : > { %p103_p11 = scmp.eq.s32.totalorder %s102_s29, 0  ;;  %v1534_v0 = vld [vmem:[%s2343_s1 + $0x2] sm:$0x3] (!%p155_p10)  ;;  %vm212_vm0 = vcmask (!%p155_p10), 1040384   ;;  %vm213_vm1 = vcmask (!%p155_p10), 1041408   ;;  %p178_p12 = scmp.lt.s32.totalorder (!%p155_p10), %s2030_s16, 1 }
  0x11   : > { %158 = sbr.rel (%p155_p10) target bundleno = 379 (0x17b), region = 32  ;;  %v2044_v1 = vmov (!%p155_p10), 65535   ;;  %v194_v3 = vld [vmem:[%s2343_s1] sm:$0x3] (!%p155_p10)  ;;  %v1543_v7 = vld [vmem:[%s2343_s1 + $0x4] sm:$0x3] (!%p155_p10) }
  0x12   : > { %s2137_s30 = scalar_select %p103_p11, %s2022_s14, %s105_s28  }
  0x13   : > { %v214_v2 = vsel (!%p155_p10), %vm212_vm0, 4294967295, %v2044_v1  ;;  %s186_s9 = smul.u32 (!%p155_p10), 68, %s2026_s15  ;;  %vm205_vm2 = vcmask (!%p155_p10), 23552   ;;  %v1552_v34 = vld [vmem:[%s2343_s1 + $0x6] sm:$0x3] (!%p155_p10)  ;;  %vm1362_vm3 = vcmask (!%p155_p10), 130048  }
  0x14   : > { %v2146_v4 = vsel (!%p155_p10), %vm213_vm1, %v214_v2, 0  ;;  %v1561_v46 = vld [vmem:[%s2343_s1 + $0x8] sm:$0x3] (!%p155_p10)  ;;  %v1570_v54 = vld [vmem:[%s2343_s1 + $0xa] sm:$0x3] (!%p155_p10)  ;;  %s1640_s5 = sshll.u32 (!%p155_p10), %s2026_s15, 1 }
  0x15   : > { %v217_v5 = vand.u32 (!%p155_p10), %v1534_v0, %v2146_v4  ;;  %v275_v6 = vand.u32 (!%p155_p10), %v2146_v4, %v194_v3  ;;  %v343_v22 = vand.u32 (!%p155_p10), %v1543_v7, %v2146_v4  ;;  %v416_v39 = vand.u32 (!%p155_p10), %v1552_v34, %v2146_v4  ;;  %v1579_v62 = vld [vmem:[%s2343_s1 + $0xc] sm:$0x3] (!%p155_p10)  ;;  %v1588_v7 = vld [vmem:[%s2343_s1 + $0xe] sm:$0x3] (!%p155_p10)  ;;  %s1641_s6 = sshll.u32 (!%p155_p10), %s2030_s16, 5  ;;  %s2045_s27 = smov (!%p155_p10), [#allocation3]  }
  0x16   : > { %v488_v50 = vand.u32 (!%p155_p10), %v1561_v46, %v2146_v4  ;;  %v560_v58 = vand.u32 (!%p155_p10), %v1570_v54, %v2146_v4  ;;  %v633_v2 = vand.u32 (!%p155_p10), %v1579_v62, %v2146_v4  ;;  %s1400_s7 = sadd.s32 (!%p155_p10), %s1641_s6, %s1640_s5  ;;  %vm1384_vm4 = vcmask (!%p155_p10), 125952   ;;  %s1952_s28 = sshll.u32 (!%p155_p10), %s2045_s27, 4  ;;  %s1953_s28 = int_to_ptr.vmem [resolvable:$false] %s1952_s28 }
  0x17   : > { %1701 = vmatprep.subr.bf16.mxu0 (!%p155_p10), %v217_v5  ;;  %1755 = vmatprep.subr.bf16.mxu1 (!%p155_p10), %v217_v5  ;;  %s1954_s29 = scalar_lea.vmem (!%p155_p10), %s1953_s28, 256 }
  0x18   : > { %s179_s8 = scalar_select %p178_p12, %s2030_s16, 1  ;;  %1702 = vmatpush3.bf16.msra.mxu0 %v217_v5  ;;  %1756 = vmatpush3.bf16.msra.mxu1 %v217_v5 }
  0x19   : > { %1707 = vmatprep.subr.bf16.mxu0 %v275_v6  ;;  %1761 = vmatprep.subr.bf16.mxu1 %v275_v6 }
  0x1a   : > { %s1873_s10 = smul.u32 1160, %s179_s8  ;;  %s1642_s8 = sshll.u32 %s1400_s7, 6 }
  0x1c   : > { %s182_s21 = scalar_lea.vmem %s2342_s0, %s1873_s10 }
  0x1d   : > { %s2155_s24 = scalar_lea.vmem %s182_s21, %s186_s9  ;;  %s2286_s21 = scalar_lea.hbm %s2345_s3, %s1642_s8 }
  0x1e   : > { %v1530_v8 = vld [vmem:[%s2155_s24 + $0x1] sm:$0xff]  ;;  %v1531_v9 = vld [vmem:[%s2155_s24 + $0x9] sm:$0xff]  ;;  %v1532_v13 = vld [vmem:[%s2155_s24 + $0x11] sm:$0xff] }
  0x1f   : > { %v1557_v10 = vld [vmem:[%s2155_s24 + $0x23] sm:$0xff]  ;;  %v201_v11 = vpack.c.bf16 %v1531_v9, %v1530_v8  ;;  %v1558_v12 = vld [vmem:[%s2155_s24 + $0x2b] sm:$0xff]  ;;  %v1533_v14 = vld [vmem:[%s2155_s24 + $0x19] sm:$0xff] }
  0x20   : > { %v2166_v15 = vpack.c.bf16 %v1558_v12, %v1557_v10  ;;  %v202_v16 = vpack.c.bf16 %v1533_v14, %v1532_v13  ;;  %v1559_v17 = vld [vmem:[%s2155_s24 + $0x33] sm:$0xff]  ;;  %v1560_v18 = vld [vmem:[%s2155_s24 + $0x3b] sm:$0xff]  ;;  %v189_v21 = vld [vmem:[%s2155_s24 + $0x8] sm:$0xff] }
  0x21   : > { %v188_v19 = vld [vmem:[%s2155_s24] sm:$0xff]  ;;  %1703 = vmatprep.mubr.msk.bf16.mxu0 %vm205_vm2, %v201_v11  ;;  %v2172_v20 = vpack.c.bf16 %v1560_v18, %v1559_v17  ;;  %v1549_v24 = vld [vmem:[%s2155_s24 + $0x2a] sm:$0xff]  ;;  %v191_v28 = vld [vmem:[%s2155_s24 + $0x18] sm:$0xff]  ;;  %v705_v11 = vand.u32 %v1588_v7, %v2146_v4 }
  0x22   : > { %v1548_v23 = vld [vmem:[%s2155_s24 + $0x22] sm:$0xff]  ;;  %1757 = vmatprep.mubr.msk.bf16.mxu1 %vm205_vm2, %v2166_v15  ;;  %1704 = vmatmul.mubr.msk.bf16.vlgmr.msra.gmra.mrb[0].mxu0 %vm205_vm2, %v202_v16  ;;  %v192_v25 = vpack.c.bf16 %v189_v21, %v188_v19  ;;  %v190_v27 = vld [vmem:[%s2155_s24 + $0x10] sm:$0xff]  ;;  %v1551_v30 = vld [vmem:[%s2155_s24 + $0x3a] sm:$0xff] }
  0x23   : > { %v405_v26 = vpack.c.bf16 %v1549_v24, %v1548_v23  ;;  %1708 = vmatpush3.bf16.msra.mxu0 %v275_v6  ;;  %1758 = vmatmul.mubr.msk.bf16.vlgmr.msra.gmra.mrb[0].mxu1 %vm205_vm2, %v2172_v20  ;;  %v1550_v29 = vld [vmem:[%s2155_s24 + $0x32] sm:$0xff]  ;;  %v1539_v31 = vld [vmem:[%s2155_s24 + $0x2] sm:$0xff]  ;;  %v1540_v32 = vld [vmem:[%s2155_s24 + $0xa] sm:$0xff]  ;;  %v193_v33 = vpack.c.bf16 %v191_v28, %v190_v27 }
  0x24   : > { %1762 = vmatpush3.bf16.msra.mxu1 %v275_v6  ;;  %1709 = vmatprep.mubr.msk.bf16.mxu0 %vm205_vm2, %v192_v25  ;;  %v1566_v35 = vld [vmem:[%s2155_s24 + $0x24] sm:$0xff]  ;;  %v1567_v36 = vld [vmem:[%s2155_s24 + $0x2c] sm:$0xff]  ;;  %v406_v37 = vpack.c.bf16 %v1551_v30, %v1550_v29  ;;  %v332_v38 = vpack.c.bf16 %v1540_v32, %v1539_v31  ;;  %v1542_v42 = vld [vmem:[%s2155_s24 + $0x1a] sm:$0xff] }
  0x25   : > { %1713 = vmatprep.subr.bf16.mxu0 %v343_v22  ;;  %1763 = vmatprep.mubr.msk.bf16.mxu1 %vm205_vm2, %v405_v26  ;;  %v549_v40 = vpack.c.bf16 %v1567_v36, %v1566_v35  ;;  %v1541_v41 = vld [vmem:[%s2155_s24 + $0x12] sm:$0xff]  ;;  %v1569_v44 = vld [vmem:[%s2155_s24 + $0x3c] sm:$0xff]  ;;  %v1575_v47 = vld [vmem:[%s2155_s24 + $0x44] sm:$0xff] }
  0x26   : > { %1767 = vmatprep.subr.bf16.mxu1 %v343_v22  ;;  %v1568_v43 = vld [vmem:[%s2155_s24 + $0x34] sm:$0xff]  ;;  %v333_v45 = vpack.c.bf16 %v1542_v42, %v1541_v41  ;;  %v1576_v48 = vld [vmem:[%s2155_s24 + $0x4c] sm:$0xff]  ;;  %v1578_v53 = vld [vmem:[%s2155_s24 + $0x5c] sm:$0xff] }
  0x27   : > { %v550_v49 = vpack.c.bf16 %v1569_v44, %v1568_v43  ;;  %v622_v51 = vpack.c.bf16 %v1576_v48, %v1575_v47  ;;  %v1577_v52 = vld [vmem:[%s2155_s24 + $0x54] sm:$0xff]  ;;  %v1584_v55 = vld [vmem:[%s2155_s24 + $0x45] sm:$0xff]  ;;  %v1587_v61 = vld [vmem:[%s2155_s24 + $0x5d] sm:$0xff] }
  0x28   : > { %v1585_v56 = vld [vmem:[%s2155_s24 + $0x4d] sm:$0xff]  ;;  %v623_v57 = vpack.c.bf16 %v1578_v53, %v1577_v52  ;;  %v1586_v60 = vld [vmem:[%s2155_s24 + $0x55] sm:$0xff]  ;;  %v1596_v6 = vld [vmem:[%s2155_s24 + $0x5e] sm:$0xff] }
  0x29   : > { %v694_v59 = vpack.c.bf16 %v1585_v56, %v1584_v55  ;;  %v1593_v63 = vld [vmem:[%s2155_s24 + $0x46] sm:$0xff]  ;;  %v1594_v0 = vld [vmem:[%s2155_s24 + $0x4e] sm:$0xff]  ;;  %v695_v1 = vpack.c.bf16 %v1587_v61, %v1586_v60  ;;  %v1595_v5 = vld [vmem:[%s2155_s24 + $0x56] sm:$0xff] }
  0x2a   : > { %v766_v3 = vpack.c.bf16 %v1594_v0, %v1593_v63  ;;  %v1614_v8 = vld [vmem:[%s2155_s24 + $0x66] sm:$0xff]  ;;  %v1615_v9 = vld [vmem:[%s2155_s24 + $0x6e] sm:$0xff]  ;;  %v767_v10 = vpack.c.bf16 %v1596_v6, %v1595_v5  ;;  %v1616_v13 = vld [vmem:[%s2155_s24 + $0x76] sm:$0xff] }
  0x2b   : > { %v1149_v12 = vpack.c.bf16 %v1615_v9, %v1614_v8  ;;  %v1617_v14 = vld [vmem:[%s2155_s24 + $0x7e] sm:$0xff]  ;;  %v1622_v16 = vld [vmem:[%s2155_s24 + $0x67] sm:$0xff]  ;;  %v1623_v17 = vld [vmem:[%s2155_s24 + $0x6f] sm:$0xff] }
  0x2c   : > { %v1150_v18 = vpack.c.bf16 %v1617_v14, %v1616_v13  ;;  %v1624_v21 = vld [vmem:[%s2155_s24 + $0x77] sm:$0xff]  ;;  %v1630_v23 = vld [vmem:[%s2155_s24 + $0x68] sm:$0xff]  ;;  %v1633_v27 = vld [vmem:[%s2155_s24 + $0x80] sm:$0xff] }
  0x2d   : > { %v1631_v24 = vld [vmem:[%s2155_s24 + $0x70] sm:$0xff]  ;;  %v1636_v30 = vld [vmem:[%s2344_s2] ss:$0 sm:$0xff] }
  0x2e   : > { %1710 = vmatmul.mubr.msk.bf16.vlgmr.msra.gmra.mrb[0].mxu0 %vm205_vm2, %v193_v33  ;;  %v1283_v25 = vpack.c.bf16 %v1631_v24, %v1630_v23 }
  0x2f   : > { %1714 = vmatpush3.bf16.msra.mxu0 %v343_v22  ;;  %1764 = vmatmul.mubr.msk.bf16.vlgmr.msra.gmra.mrb[0].mxu1 %vm205_vm2, %v406_v37 }
  0x30   : > { %1768 = vmatpush3.bf16.msra.mxu1 %v343_v22  ;;  %1715 = vmatprep.mubr.msk.bf16.mxu0 %vm205_vm2, %v332_v38  ;;  %v1625_v22 = vld [vmem:[%s2155_s24 + $0x7f] sm:$0xff] }
  0x31   : > { %1719 = vmatprep.subr.bf16.mxu0 %v416_v39  ;;  %1769 = vmatprep.mubr.msk.bf16.mxu1 %vm205_vm2, %v549_v40 }
  0x32   : > { %1773 = vmatprep.subr.bf16.mxu1 %v416_v39 }
  0x3a   : > { %1716 = vmatmul.mubr.msk.bf16.vlgmr.msra.gmra.mrb[0].mxu0 %vm205_vm2, %v333_v45 }
  0x3b   : > { %1720 = vmatpush3.bf16.msra.mxu0 %v416_v39  ;;  %1770 = vmatmul.mubr.msk.bf16.vlgmr.msra.gmra.mrb[0].mxu1 %vm205_vm2, %v550_v49 }
  0x3c   : > { %1774 = vmatpush3.bf16.msra.mxu1 %v416_v39  ;;  %1721 = vmatprep.mubr.msk.bf16.mxu0 %vm205_vm2, %v405_v26  ;;  %v1632_v26 = vld [vmem:[%s2155_s24 + $0x78] sm:$0xff]  ;;  %s175_s24 = sand.u32 1, %s2018_s13  }
  0x3d   : > { %1725 = vmatprep.subr.bf16.mxu0 %v488_v50  ;;  %1775 = vmatprep.mubr.msk.bf16.mxu1 %vm205_vm2, %v622_v51  ;;  %v1284_v28 = vpack.c.bf16 %v1633_v27, %v1632_v26  ;;  %s1528_s4 = sshll.u32 %s175_s24, 3  ;;  %s2290_s15 = scalar_lea.sflag [#allocation4], %s175_s24 }
  0x3e   : > { %1779 = vmatprep.subr.bf16.mxu1 %v488_v50  ;;  %s177_s9 = scalar_lea.vmem [#allocation3], %s1528_s4 }
  0x3f   : > { %s1403_s10 = sshll.u32 %s177_s9, 4  ;;  %s2288_s10 = int_to_ptr.vmem [resolvable:$true] %s1403_s10 }
  0x40   : > { %s1948_s16 = scalar_lea.vmem %s2288_s10, 128  ;;  %p1955_p2 = scmp.lt.s32.totalorder %s2288_s10, %s1953_s28 }
  0x41   : > { %p1949_p13 = scmp.ne.s32.totalorder %s2288_s10, %s1948_s16  ;;  %p1956_p4 = scmp.lt.s32.totalorder %s1954_s29, %s1948_s16 }
  0x43   : > { %p1950_p0 = pnand %p1949_p13, %p2119_p3  ;;  %p1957_p5 = por %p1956_p4, %p1955_p2 }
  0x45   : > { %p1951_p1 = pneg %p1950_p0 }
  0x46   : > { %1722 = vmatmul.mubr.msk.bf16.vlgmr.msra.gmra.mrb[0].mxu0 %vm205_vm2, %v406_v37 }
  0x47   : > { %1726 = vmatpush3.bf16.msra.mxu0 %v488_v50  ;;  %1776 = vmatmul.mubr.msk.bf16.vlgmr.msra.gmra.mrb[0].mxu1 %vm205_vm2, %v623_v57  ;;  %p1958_p6 = pnand %p1957_p5, %p1951_p1 }
  0x48   : > { %1780 = vmatpush3.bf16.msra.mxu1 %v488_v50  ;;  %1727 = vmatprep.mubr.msk.bf16.mxu0 %vm205_vm2, %v2166_v15  ;;  %v1597_v15 = vld [vmem:[%s2343_s1 + $0x10] sm:$0x3] }
  0x49   : > { %1731 = vmatprep.subr.bf16.mxu0 %v560_v58  ;;  %1781 = vmatprep.mubr.msk.bf16.mxu1 %vm205_vm2, %v694_v59  ;;  %v777_v19 = vand.u32 %v1597_v15, %v2146_v4  ;;  %v1217_v4 = vpack.c.bf16 %v1625_v22, %v1624_v21 }
  0x4a   : > { %1785 = vmatprep.subr.bf16.mxu1 %v560_v58 }
  0x52   : > { %1728 = vmatmul.mubr.msk.bf16.vlgmr.msra.gmra.mrb[0].mxu0 %vm205_vm2, %v2172_v20  ;;  %v1216_v20 = vpack.c.bf16 %v1623_v17, %v1622_v16 }
  0x53   : > { %1732 = vmatpush3.bf16.msra.mxu0 %v560_v58  ;;  %1782 = vmatmul.mubr.msk.bf16.vlgmr.msra.gmra.mrb[0].mxu1 %vm205_vm2, %v695_v1 }
  0x54   : > { %1786 = vmatpush3.bf16.msra.mxu1 %v560_v58  ;;  %1733 = vmatprep.mubr.msk.bf16.mxu0 %vm205_vm2, %v549_v40 }
  0x55   : > { %1737 = vmatprep.subr.bf16.mxu0 %v633_v2  ;;  %1787 = vmatprep.mubr.msk.bf16.mxu1 %vm205_vm2, %v766_v3 }
  0x56   : > { %1791 = vmatprep.subr.bf16.mxu1 %v633_v2 }
  0x5e   : > { %1734 = vmatmul.mubr.msk.bf16.vlgmr.msra.gmra.mrb[0].mxu0 %vm205_vm2, %v550_v49 }
  0x5f   : > { %1738 = vmatpush3.bf16.msra.mxu0 %v633_v2  ;;  %1788 = vmatmul.mubr.msk.bf16.vlgmr.msra.gmra.mrb[0].mxu1 %vm205_vm2, %v767_v10 }
  0x60   : > { %1792 = vmatpush3.bf16.msra.mxu1 %v633_v2  ;;  %1739 = vmatprep.mubr.msk.bf16.mxu0 %vm205_vm2, %v622_v51 }
  0x61   : > { %1743 = vmatprep.subr.bf16.mxu0 %v705_v11  ;;  %1793 = vmatprep.mubr.msk.bf16.mxu1 %vm205_vm2, %v1149_v12 }
  0x62   : > { %1797 = vmatprep.subr.bf16.mxu1 %v705_v11 }
  0x6a   : > { %1740 = vmatmul.mubr.msk.bf16.vlgmr.msra.gmra.mrb[0].mxu0 %vm205_vm2, %v623_v57 }
  0x6b   : > { %1744 = vmatpush3.bf16.msra.mxu0 %v705_v11  ;;  %1794 = vmatmul.mubr.msk.bf16.vlgmr.msra.gmra.mrb[0].mxu1 %vm205_vm2, %v1150_v18 }
  0x6c   : > { %1798 = vmatpush3.bf16.msra.mxu1 %v705_v11  ;;  %1745 = vmatprep.mubr.msk.bf16.mxu0 %vm205_vm2, %v694_v59 }
  0x6d   : > { %1749 = vmatprep.subr.bf16.mxu0 %v777_v19  ;;  %1799 = vmatprep.mubr.msk.bf16.mxu1 %vm205_vm2, %v1216_v20 }
  0x6e   : > { %1803 = vmatprep.subr.bf16.mxu1 %v777_v19 }
  0x76   : > { %1746 = vmatmul.mubr.msk.bf16.vlgmr.msra.gmra.mrb[0].mxu0 %vm205_vm2, %v695_v1 }
  0x77   : > { %1750 = vmatpush3.bf16.msra.mxu0 %v777_v19  ;;  %1800 = vmatmul.mubr.msk.bf16.vlgmr.msra.gmra.mrb[0].mxu1 %vm205_vm2, %v1217_v4 }
  0x78   : > { %1804 = vmatpush3.bf16.msra.mxu1 %v777_v19  ;;  %1751 = vmatprep.mubr.msk.bf16.mxu0 %vm205_vm2, %v766_v3 }
  0x79   : > { %1805 = vmatprep.mubr.msk.bf16.mxu1 %vm205_vm2, %v1283_v25 }
  0x82   : > { %1752 = vmatmul.mubr.msk.bf16.vlgmr.msra.gmra.mrb[0].mxu0 %vm205_vm2, %v767_v10 }
  0x83   : > { %1806 = vmatmul.mubr.msk.bf16.vlgmr.msra.gmra.mrb[0].mxu1 %vm205_vm2, %v1284_v28 }
 0x155   : > { %v1753_v29 = vpop.f32.mrb[0].mxu0 }
 0x156   : > { %v1807_v31 = vpop.f32.mrb[0].mxu1  ;;  %v813_v32 = vpop.f32.mrb[1].mxu0 }
 0x157   : > { %v1346_v33 = vmax.f32 %v1753_v29, %v1807_v31  ;;  %v1325_v34 = vpop.f32.mrb[1].mxu1  ;;  %v1754_v35 = vpop.f32.mrb[2].mxu0 }
 0x158   : > { %v1344_v36 = vmax.f32 %v813_v32, %v1325_v34  ;;  %v1808_v37 = vpop.f32.mrb[2].mxu1  ;;  %v816_v38 = vpop.f32.mrb[3].mxu0 }
 0x159   : > { %v1356_v39 = vadd.f32 %v1636_v30, %v1346_v33  ;;  %v1347_v40 = vmax.f32 %v1754_v35, %v1808_v37  ;;  %v1328_v41 = vpop.f32.mrb[3].mxu1 }
 0x15a   : > { %v1354_v42 = vadd.f32 %v1636_v30, %v1344_v36  ;;  %v1345_v43 = vmax.f32 %v816_v38, %v1328_v41 }
 0x15b   : > { %v1360_v44 = vmax.f32 %v1356_v39, 0.0  ;;  %v1357_v45 = vadd.f32 %v1636_v30, %v1347_v40 }
 0x15c   : > { %v1358_v46 = vmax.f32 %v1354_v42, 0.0  ;;  %v1355_v47 = vadd.f32 %v1636_v30, %v1345_v43 }
 0x15d   : > { %1365 = vst.msk [vmem:[#allocation2 + $0x10] sm:$0xff] %vm1362_vm3, %v1360_v44  ;;  %v1361_v48 = vmax.f32 %v1357_v45, 0.0 }
 0x15e   : > { %1363 = vst.msk [vmem:[#allocation2] sm:$0xff] %vm1362_vm3, %v1358_v46  ;;  %v1359_v49 = vmax.f32 %v1355_v47, 0.0 }
 0x15f   : > { %1366 = vst.msk [vmem:[#allocation2 + $0x18] sm:$0xff] %vm1362_vm3, %v1361_v48 }
 0x160   : > { %1364 = vst.msk [vmem:[#allocation2 + $0x8] sm:$0xff] %vm1362_vm3, %v1359_v49 }
 0x166   : > { %v1369_v50 = vld [vmem:[#allocation2 + $0x10] ss:$2 sm:$0xff]  ;;  %v1373_v51 = vld [vmem:[#allocation2 + $0x11] ss:$2 sm:$0xff] }
 0x167   : > { %v1367_v52 = vld [vmem:[#allocation2] ss:$2 sm:$0xff]  ;;  %v1371_v53 = vld [vmem:[#allocation2 + $0x1] ss:$2 sm:$0xff]  ;;  %v1375_v54 = vmax.f32 %v1369_v50, %v1373_v51 }
 0x168   : > { %v1374_v55 = vmax.f32 %v1367_v52, %v1371_v53 }
 0x169   : > { %v1646_v56 = vpack.c.bf16 %v1375_v54, %v1375_v54 }
 0x16a   : > { %v1645_v57 = vpack.c.bf16 %v1374_v55, %v1374_v55 }
 0x16b   : > { %1386 = vst.msk [vmem:[%s177_s9 + $0x4] sm:$0xf] %vm1384_vm4, %v1646_v56 }
 0x16c   : > { %1385 = vst.msk [vmem:[%s177_s9] sm:$0xf] %vm1384_vm4, %v1645_v57 }
 0x16d   : > { %1961 = shalt.err (!%p1958_p6)
}
 0x16e   : > { %s1962_s24 = scalar_lea.hbm %s2286_s21, 128  ;;  %s1966_s6 = scalar_lea.hbm %s2345_s3, 4096 }
 0x16f   : > { %p1963_p7 = scmp.ne.s32.totalorder %s2286_s21, %s1962_s24  ;;  %p1967_p11 = scmp.lt.u32.totalorder %s2286_s21, %s2345_s3 }
 0x170   : > { %p1968_p12 = scmp.lt.u32.totalorder %s1966_s6, %s1962_s24  ;;  %p1970_p0 = scmp.lt.u32.totalorder %s1962_s24, %s2286_s21 }
 0x171   : > { %p1964_p9 = pnand %p1963_p7, %p2119_p3 }
 0x172   : > { %p1969_p13 = por %p1968_p12, %p1967_p11 }
 0x173   : > { %p1965_p10 = pneg %p1964_p9 }
 0x174   : > { %p1971_p1 = por %p1970_p0, %p1969_p13 }
 0x176   : > { %p1972_p2 = pnand %p1971_p1, %p1965_p10 }
 0x178   : > { %1975 = shalt.err (!%p1972_p2)
}
 0x179   : > { %s2046_s9 = smov 64   ;;  %s2047_s11 = smov 4  }
 0x17a   : > { %1874 = dma.vmem_to_hbm [thread:$0]  (%p2119_p3), %s2288_s10, 128, %s2286_s21, %s2290_s15, %s2046_s9, %s2046_s9, %s2047_s11  }
 0x17b PF: > { %p1880_p4 = scmp.ge.s32.totalorder %s2042_s19, 2  ;;  %s1418_s20 = sand.u32 1, %s2014_s12  }
 0x17c   : > { %s1419_s16 = scalar_lea.sflag [#allocation4], %s1418_s20 }
 0x17d   : > { %p1877_p5 = pnand %p1880_p4, %p2128_p8 }
 0x17f   : > { %2009 = dma.done.wait (!%p1877_p5), %s1419_s16, 128  }
 0x180   : > { %2011 = vsyncadd (!%p1877_p5), %s1419_s16, 4294967168  ;;  %s16_s19 = sadd.s32 1, %s2042_s19   ;;  %s2348_s12 = smov %s2018_s13 }
 0x181   : > { %p13_p6 = scmp.ge.s32.totalorder %s16_s19, 34   ;;  %s2349_s13 = smov %s2022_s14 }
 0x182   : > { %s2350_s14 = smov %s2137_s30  ;;  %s2351_s15 = smov %s2034_s17 }
 0x183   : > { %s2352_s16 = smov %s2038_s18  ;;  %s2353_s17 = smov %s2356_s22 }
 0x184   : > { %s2354_s18 = smov %s2360_s23  ;;  %15 = sbr.rel (!%p13_p6) target bundleno = 5 (0x5), region = 90 }
 0x18b   :  { %1424 = vsyncpa [#allocation4], 1 }
 0x18c   :  { %1426 = vsyncpa [#allocation4 + $0x1], 1 }

</bundles_post_ra>
